<compile_context>
chip_gen: v7x
topology: tpu7x:2x2x1
jax: 0.10.0
libtpu: 0.0.40
codegen_flags: <defaults>
</compile_context>

<pallas_src>
import jax
import jax.numpy as jnp
from jax.experimental import pallas as pl
from jax.experimental.pallas import tpu as pltpu

EPS = 1e-5


def _make_kernel(N, C, H, W):
    HW = H * W
    L = N * HW                       # fused batch*spatial lane axis
    inv_cnt = 1.0 / float(L)

    # pltpu.roll follows the jnp.roll convention: out[p] = x[(p - shift) % L].
    def shift_minus(a, d):           # value at lane p is a[p - d] (circular)
        return pltpu.roll(a, d, 1)

    def shift_plus(a, d):            # value at lane p is a[p + d] (circular)
        return pltpu.roll(a, L - d, 1)

    def kernel(x_ref, w1_ref, w2_ref, g1_ref, b1_ref, g2_ref, b2_ref, out_ref):
        x = x_ref[...]                                       # (C, N*HW) f32

        # Edge-clamp masks for ReplicationPad2d(1), computed once on a single
        # (1, L) lane row and broadcast over channels.
        pos = jax.lax.broadcasted_iota(jnp.int32, (1, L), 1)
        sp = pos % HW                                        # position in image
        w_i = sp % W
        is_w0, is_wl = w_i == 0, w_i == W - 1
        is_h0, is_hl = sp < W, sp >= HW - W

        def taps(a):
            """9 edge-replicated 3x3 shifts of `a` (C, L), ordered kh*3 + kw."""
            up = jnp.where(is_h0, a, shift_minus(a, W))      # kh=0 reads h-1
            dn = jnp.where(is_hl, a, shift_plus(a, W))       # kh=2 reads h+1
            out = []
            for r in (up, a, dn):                            # kh = 0, 1, 2
                out.append(jnp.where(is_w0, r, shift_minus(r, 1)))  # kw=0: w-1
                out.append(r)                                        # kw=1
                out.append(jnp.where(is_wl, r, shift_plus(r, 1)))    # kw=2: w+1
            return out                                       # 9 x (C, L)

        def conv_bn(a, wmat, gamma, beta):
            # im2col panel in f32 (aligned 8-row groups), one bf16 cast, and a
            # single MXU matmul per stage: (C, 9C) @ (9C, N*HW), f32 accumulate.
            pn = jnp.concatenate(taps(a), axis=0).astype(jnp.bfloat16)
            acc = jnp.dot(wmat, pn, preferred_element_type=jnp.float32)

            # Batch statistics per output channel over N*H*W: one lane
            # reduction per channel row, fused as scale/bias.
            s = jnp.sum(acc, axis=1, keepdims=True)          # (C, 1)
            sq = jnp.sum(acc * acc, axis=1, keepdims=True)   # (C, 1)
            mean = s * inv_cnt
            var = jnp.maximum(sq * inv_cnt - mean * mean, 0.0)   # clamp >= 0
            scale = gamma * jax.lax.rsqrt(var + EPS)         # (C, 1)
            bias = beta - mean * scale
            return acc * scale + bias                        # fused BN affine

        o1 = jnp.maximum(conv_bn(x, w1_ref[...], g1_ref[...], b1_ref[...]), 0.0)
        o2 = conv_bn(o1, w2_ref[...], g2_ref[...], b2_ref[...]) + x  # residual
        out_ref[...] = jnp.maximum(o2, 0.0)

    return kernel


def basic_block_forward(x_nchw, params):
    """BasicBlock forward (stride=1, groups=1, no downsample). x: (N, C, H, W) f32."""
    N, C, H, W = x_nchw.shape
    HW = H * W
    L = N * HW

    # Channel-major: (C, N*H*W).  Lanes carry batch*spatial.
    x_cm = jnp.transpose(x_nchw, (1, 0, 2, 3)).reshape(C, L).astype(jnp.float32)
    # Conv weights HWIO (3,3,Cin,Cout) -> (Cout, 9*Cin), bf16 for the MXU.
    # Column order (kh*3+kw)*Cin + cin matches the tap-concat row order.
    wt1 = params["w1"].reshape(9 * C, C).T.astype(jnp.bfloat16)
    wt2 = params["w2"].reshape(9 * C, C).T.astype(jnp.bfloat16)
    g1 = params["g1"].reshape(C, 1).astype(jnp.float32)
    b1 = params["b1"].reshape(C, 1).astype(jnp.float32)
    g2 = params["g2"].reshape(C, 1).astype(jnp.float32)
    b2 = params["b2"].reshape(C, 1).astype(jnp.float32)

    def full(shape):
        return pl.BlockSpec(shape, lambda i: (0,) * len(shape))

    flops = 2 * (2 * C * 9 * C * L)                          # two conv stages
    bytes_accessed = 2 * C * L * 4 + 2 * 9 * C * C * 2 + 4 * C * 4

    out_flat = pl.pallas_call(
        _make_kernel(N, C, H, W),
        out_shape=jax.ShapeDtypeStruct((C, L), jnp.float32),
        grid=(1,),
        in_specs=[full(x_cm.shape), full(wt1.shape), full(wt2.shape),
                  full(g1.shape), full(b1.shape), full(g2.shape), full(b2.shape)],
        out_specs=full((C, L)),
        compiler_params=pltpu.CompilerParams(
            dimension_semantics=("arbitrary",),
            vmem_limit_bytes=32 * 1024 * 1024),
        cost_estimate=pl.CostEstimate(
            flops=flops, transcendentals=2 * C, bytes_accessed=bytes_accessed),
    )(x_cm, wt1, wt2, g1, b1, g2, b2)

    return jnp.transpose(out_flat.reshape(C, N, H, W), (1, 0, 2, 3))


def _reference(x_nchw, params):
    """Pure-JAX reference mirroring the PyTorch module (bf16 conv, f32 BN/ReLU)."""
    x = jnp.transpose(x_nchw, (0, 2, 3, 1)).astype(jnp.float32)   # NHWC

    def conv(inp, w):
        p = jnp.pad(inp, ((0, 0), (1, 1), (1, 1), (0, 0)), mode="edge")
        return jax.lax.conv_general_dilated(
            p.astype(jnp.bfloat16), w.astype(jnp.bfloat16),
            window_strides=(1, 1), padding="VALID",
            dimension_numbers=("NHWC", "HWIO", "NHWC"),
            preferred_element_type=jnp.float32)

    def bn(inp, g, b):
        m = jnp.mean(inp, axis=(0, 1, 2), keepdims=True)
        v = jnp.mean((inp - m) ** 2, axis=(0, 1, 2), keepdims=True)
        return (inp - m) * jax.lax.rsqrt(v + EPS) * g.reshape(1, 1, 1, -1) \
            + b.reshape(1, 1, 1, -1)

    o = jnp.maximum(bn(conv(x, params["w1"]), params["g1"], params["b1"]), 0.0)
    o = bn(conv(o, params["w2"]), params["g2"], params["b2"]) + x
    o = jnp.maximum(o, 0.0)
    return jnp.transpose(o, (0, 3, 1, 2))


if __name__ == "__main__":
    key = jax.random.PRNGKey(0)
    N, C, H, W = 2, 8, 16, 16            # inplanes == planes (no downsample)
    k_x, k_w1, k_w2, k_g1, k_b1, k_g2, k_b2 = jax.random.split(key, 7)

    x = jax.random.normal(k_x, (N, C, H, W), jnp.float32)

    # Synthetic parameters: conv weights in HWIO, BN affine per channel.
    params = {
        "w1": 0.1 * jax.random.normal(k_w1, (3, 3, C, C), jnp.float32),
        "w2": 0.1 * jax.random.normal(k_w2, (3, 3, C, C), jnp.float32),
        "g1": 1.0 + 0.1 * jax.random.normal(k_g1, (1, C), jnp.float32),
        "b1": 0.1 * jax.random.normal(k_b1, (1, C), jnp.float32),
        "g2": 1.0 + 0.1 * jax.random.normal(k_g2, (1, C), jnp.float32),
        "b2": 0.1 * jax.random.normal(k_b2, (1, C), jnp.float32),
    }

    out = jax.block_until_ready(basic_block_forward(x, params))
    ref = jax.block_until_ready(_reference(x, params))

    assert out.shape == (N, C, H, W)
    max_err = float(jnp.max(jnp.abs(out - ref)))
    assert jnp.allclose(out, ref, rtol=1e-2, atol=1e-2), (
        f"mismatch vs reference, max |diff| = {max_err}")
    print("KERNEL_OK")
</pallas_src>

<mosaic_0001>
module attributes {stable_mosaic.version = 11 : i64} {
  func.func @kernel(%arg0: i32, %arg1: memref<8x512xf32, #tpu.memory_space<vmem>>, %arg2: memref<8x72xbf16, #tpu.memory_space<vmem>>, %arg3: memref<8x72xbf16, #tpu.memory_space<vmem>>, %arg4: memref<8x1xf32, #tpu.memory_space<vmem>>, %arg5: memref<8x1xf32, #tpu.memory_space<vmem>>, %arg6: memref<8x1xf32, #tpu.memory_space<vmem>>, %arg7: memref<8x1xf32, #tpu.memory_space<vmem>>, %arg8: memref<8x512xf32, #tpu.memory_space<vmem>>) attributes {dimension_semantics = [#tpu.dimension_semantics<arbitrary>], iteration_bounds = array<i64: 1>, scalar_prefetch = 0 : i64, scratch_operands = 0 : i64, tpu.core_type = #tpu.core_type<tc>, window_params = [{pipeline_mode = #tpu.pipeline_mode<synchronous>, transform_indices = @transform_0, window_bounds = array<i64: 8, 512>}, {pipeline_mode = #tpu.pipeline_mode<synchronous>, transform_indices = @transform_1, window_bounds = array<i64: 8, 72>}, {pipeline_mode = #tpu.pipeline_mode<synchronous>, transform_indices = @transform_2, window_bounds = array<i64: 8, 72>}, {pipeline_mode = #tpu.pipeline_mode<synchronous>, transform_indices = @transform_3, window_bounds = array<i64: 8, 1>}, {pipeline_mode = #tpu.pipeline_mode<synchronous>, transform_indices = @transform_4, window_bounds = array<i64: 8, 1>}, {pipeline_mode = #tpu.pipeline_mode<synchronous>, transform_indices = @transform_5, window_bounds = array<i64: 8, 1>}, {pipeline_mode = #tpu.pipeline_mode<synchronous>, transform_indices = @transform_6, window_bounds = array<i64: 8, 1>}, {pipeline_mode = #tpu.pipeline_mode<synchronous>, transform_indices = @transform_7, window_bounds = array<i64: 8, 512>}]} {
    %c0 = arith.constant 0 : index
    %c0_0 = arith.constant 0 : index
    %0 = vector.load %arg1[%c0, %c0_0] : memref<8x512xf32, #tpu.memory_space<vmem>>, vector<8x512xf32>
    %1 = tpu.iota {dimensions = array<i32: 1>} : vector<1x512xi32>
    %c256_i32 = arith.constant 256 : i32
    %c0_i32 = arith.constant 0 : i32
    %2 = arith.cmpi eq, %c256_i32, %c0_i32 : i32
    %c1_i32 = arith.constant 1 : i32
    %3 = arith.select %2, %c1_i32, %c256_i32 : i32
    %4 = vector.broadcast %3 : i32 to vector<1x512xi32>
    %5 = arith.remsi %1, %4 : vector<1x512xi32>
    %c0_i32_1 = arith.constant 0 : i32
    %6 = vector.broadcast %c0_i32_1 : i32 to vector<1x512xi32>
    %7 = arith.cmpi ne, %5, %6 : vector<1x512xi32>
    %c0_i32_2 = arith.constant 0 : i32
    %8 = vector.broadcast %c0_i32_2 : i32 to vector<1x512xi32>
    %9 = arith.cmpi slt, %5, %8 : vector<1x512xi32>
    %c0_i32_3 = arith.constant 0 : i32
    %10 = arith.cmpi slt, %3, %c0_i32_3 : i32
    %11 = vector.broadcast %10 : i1 to vector<1x512xi1>
    %12 = vector.broadcast %11 : vector<1x512xi1> to vector<1x512xi1>
    %13 = arith.xori %9, %12 : vector<1x512xi1>
    %14 = arith.andi %13, %7 : vector<1x512xi1>
    %15 = vector.broadcast %3 : i32 to vector<1x512xi32>
    %16 = arith.addi %5, %15 : vector<1x512xi32>
    %17 = arith.select %14, %16, %5 : vector<1x512xi1>, vector<1x512xi32>
    %c16_i32 = arith.constant 16 : i32
    %c0_i32_4 = arith.constant 0 : i32
    %18 = arith.cmpi eq, %c16_i32, %c0_i32_4 : i32
    %c1_i32_5 = arith.constant 1 : i32
    %19 = arith.select %18, %c1_i32_5, %c16_i32 : i32
    %20 = vector.broadcast %19 : i32 to vector<1x512xi32>
    %21 = arith.remsi %17, %20 : vector<1x512xi32>
    %c0_i32_6 = arith.constant 0 : i32
    %22 = vector.broadcast %c0_i32_6 : i32 to vector<1x512xi32>
    %23 = arith.cmpi ne, %21, %22 : vector<1x512xi32>
    %c0_i32_7 = arith.constant 0 : i32
    %24 = vector.broadcast %c0_i32_7 : i32 to vector<1x512xi32>
    %25 = arith.cmpi slt, %21, %24 : vector<1x512xi32>
    %c0_i32_8 = arith.constant 0 : i32
    %26 = arith.cmpi slt, %19, %c0_i32_8 : i32
    %27 = vector.broadcast %26 : i1 to vector<1x512xi1>
    %28 = vector.broadcast %27 : vector<1x512xi1> to vector<1x512xi1>
    %29 = arith.xori %25, %28 : vector<1x512xi1>
    %30 = arith.andi %29, %23 : vector<1x512xi1>
    %31 = vector.broadcast %19 : i32 to vector<1x512xi32>
    %32 = arith.addi %21, %31 : vector<1x512xi32>
    %33 = arith.select %30, %32, %21 : vector<1x512xi1>, vector<1x512xi32>
    %c0_i32_9 = arith.constant 0 : i32
    %34 = vector.broadcast %c0_i32_9 : i32 to vector<1x512xi32>
    %35 = arith.cmpi eq, %33, %34 : vector<1x512xi32>
    %c15_i32 = arith.constant 15 : i32
    %36 = vector.broadcast %c15_i32 : i32 to vector<1x512xi32>
    %37 = arith.cmpi eq, %33, %36 : vector<1x512xi32>
    %c16_i32_10 = arith.constant 16 : i32
    %38 = vector.broadcast %c16_i32_10 : i32 to vector<1x512xi32>
    %39 = arith.cmpi slt, %17, %38 : vector<1x512xi32>
    %c240_i32 = arith.constant 240 : i32
    %40 = vector.broadcast %c240_i32 : i32 to vector<1x512xi32>
    %41 = arith.cmpi sge, %17, %40 : vector<1x512xi32>
    %c0_11 = arith.constant 0 : index
    %c0_12 = arith.constant 0 : index
    %42 = vector.load %arg2[%c0_11, %c0_12] : memref<8x72xbf16, #tpu.memory_space<vmem>>, vector<8x72xbf16>
    %c0_13 = arith.constant 0 : index
    %c0_14 = arith.constant 0 : index
    %43 = vector.load %arg4[%c0_13, %c0_14] : memref<8x1xf32, #tpu.memory_space<vmem>>, vector<8x1xf32>
    %c0_15 = arith.constant 0 : index
    %c0_16 = arith.constant 0 : index
    %44 = vector.load %arg5[%c0_15, %c0_16] : memref<8x1xf32, #tpu.memory_space<vmem>>, vector<8x1xf32>
    %c16_i32_17 = arith.constant 16 : i32
    %45 = tpu.dynamic_rotate %0 by %c16_i32_17 dim 1 : vector<8x512xf32>, i32 -> vector<8x512xf32>
    %46 = vector.shape_cast %39 : vector<1x512xi1> to vector<1x512xi1>
    %47 = vector.broadcast %46 : vector<1x512xi1> to vector<8x512xi1>
    %48 = arith.select %47, %0, %45 : vector<8x512xi1>, vector<8x512xf32>
    %c496_i32 = arith.constant 496 : i32
    %49 = tpu.dynamic_rotate %0 by %c496_i32 dim 1 : vector<8x512xf32>, i32 -> vector<8x512xf32>
    %50 = vector.shape_cast %41 : vector<1x512xi1> to vector<1x512xi1>
    %51 = vector.broadcast %50 : vector<1x512xi1> to vector<8x512xi1>
    %52 = arith.select %51, %0, %49 : vector<8x512xi1>, vector<8x512xf32>
    %c1_i32_18 = arith.constant 1 : i32
    %53 = tpu.dynamic_rotate %48 by %c1_i32_18 dim 1 : vector<8x512xf32>, i32 -> vector<8x512xf32>
    %54 = vector.shape_cast %35 : vector<1x512xi1> to vector<1x512xi1>
    %55 = vector.broadcast %54 : vector<1x512xi1> to vector<8x512xi1>
    %56 = arith.select %55, %48, %53 : vector<8x512xi1>, vector<8x512xf32>
    %c511_i32 = arith.constant 511 : i32
    %57 = tpu.dynamic_rotate %48 by %c511_i32 dim 1 : vector<8x512xf32>, i32 -> vector<8x512xf32>
    %58 = vector.shape_cast %37 : vector<1x512xi1> to vector<1x512xi1>
    %59 = vector.broadcast %58 : vector<1x512xi1> to vector<8x512xi1>
    %60 = arith.select %59, %48, %57 : vector<8x512xi1>, vector<8x512xf32>
    %c1_i32_19 = arith.constant 1 : i32
    %61 = tpu.dynamic_rotate %0 by %c1_i32_19 dim 1 : vector<8x512xf32>, i32 -> vector<8x512xf32>
    %62 = vector.shape_cast %35 : vector<1x512xi1> to vector<1x512xi1>
    %63 = vector.broadcast %62 : vector<1x512xi1> to vector<8x512xi1>
    %64 = arith.select %63, %0, %61 : vector<8x512xi1>, vector<8x512xf32>
    %c511_i32_20 = arith.constant 511 : i32
    %65 = tpu.dynamic_rotate %0 by %c511_i32_20 dim 1 : vector<8x512xf32>, i32 -> vector<8x512xf32>
    %66 = vector.shape_cast %37 : vector<1x512xi1> to vector<1x512xi1>
    %67 = vector.broadcast %66 : vector<1x512xi1> to vector<8x512xi1>
    %68 = arith.select %67, %0, %65 : vector<8x512xi1>, vector<8x512xf32>
    %c1_i32_21 = arith.constant 1 : i32
    %69 = tpu.dynamic_rotate %52 by %c1_i32_21 dim 1 : vector<8x512xf32>, i32 -> vector<8x512xf32>
    %70 = vector.shape_cast %35 : vector<1x512xi1> to vector<1x512xi1>
    %71 = vector.broadcast %70 : vector<1x512xi1> to vector<8x512xi1>
    %72 = arith.select %71, %52, %69 : vector<8x512xi1>, vector<8x512xf32>
    %c511_i32_22 = arith.constant 511 : i32
    %73 = tpu.dynamic_rotate %52 by %c511_i32_22 dim 1 : vector<8x512xf32>, i32 -> vector<8x512xf32>
    %74 = vector.shape_cast %37 : vector<1x512xi1> to vector<1x512xi1>
    %75 = vector.broadcast %74 : vector<1x512xi1> to vector<8x512xi1>
    %76 = arith.select %75, %52, %73 : vector<8x512xi1>, vector<8x512xf32>
    %77 = tpu.concatenate %56, %48, %60, %64, %0, %68, %72, %52, %76 in 0 : vector<8x512xf32>, vector<8x512xf32>, vector<8x512xf32>, vector<8x512xf32>, vector<8x512xf32>, vector<8x512xf32>, vector<8x512xf32>, vector<8x512xf32>, vector<8x512xf32> -> vector<72x512xf32>
    %78 = arith.truncf %77 : vector<72x512xf32> to vector<72x512xbf16>
    %cst = arith.constant dense<0.000000e+00> : vector<8x512xf32>
    %79 = tpu.matmul %42, %78, %cst {dimension_numbers = #tpu.dot_dimension_numbers<[1], [0], [0], [1], [0, 0, 1, 1], [], []>} : vector<8x72xbf16>, vector<72x512xbf16>, vector<8x512xf32> -> vector<8x512xf32>
    %cst_23 = arith.constant dense<0.000000e+00> : vector<8xf32>
    %80 = vector.multi_reduction <add>, %79, %cst_23 [1] : vector<8x512xf32> to vector<8xf32>
    %81 = vector.shape_cast %80 : vector<8xf32> to vector<8x1xf32>
    %82 = arith.mulf %79, %79 : vector<8x512xf32>
    %cst_24 = arith.constant dense<0.000000e+00> : vector<8xf32>
    %83 = vector.multi_reduction <add>, %82, %cst_24 [1] : vector<8x512xf32> to vector<8xf32>
    %84 = vector.shape_cast %83 : vector<8xf32> to vector<8x1xf32>
    %cst_25 = arith.constant 0.001953125 : f32
    %85 = vector.broadcast %cst_25 : f32 to vector<8x1xf32>
    %86 = arith.mulf %81, %85 : vector<8x1xf32>
    %cst_26 = arith.constant 0.001953125 : f32
    %87 = vector.broadcast %cst_26 : f32 to vector<8x1xf32>
    %88 = arith.mulf %84, %87 : vector<8x1xf32>
    %89 = arith.mulf %86, %86 : vector<8x1xf32>
    %90 = arith.subf %88, %89 : vector<8x1xf32>
    %cst_27 = arith.constant 0.000000e+00 : f32
    %91 = vector.broadcast %cst_27 : f32 to vector<8x1xf32>
    %92 = arith.maximumf %90, %91 : vector<8x1xf32>
    %cst_28 = arith.constant 9.99999974E-6 : f32
    %93 = vector.broadcast %cst_28 : f32 to vector<8x1xf32>
    %94 = arith.addf %92, %93 : vector<8x1xf32>
    %95 = math.rsqrt %94 : vector<8x1xf32>
    %96 = arith.mulf %43, %95 : vector<8x1xf32>
    %97 = arith.mulf %86, %96 : vector<8x1xf32>
    %98 = arith.subf %44, %97 : vector<8x1xf32>
    %99 = vector.broadcast %96 : vector<8x1xf32> to vector<8x512xf32>
    %100 = arith.mulf %79, %99 : vector<8x512xf32>
    %101 = vector.broadcast %98 : vector<8x1xf32> to vector<8x512xf32>
    %102 = arith.addf %100, %101 : vector<8x512xf32>
    %cst_29 = arith.constant 0.000000e+00 : f32
    %103 = vector.broadcast %cst_29 : f32 to vector<8x512xf32>
    %104 = arith.maximumf %102, %103 : vector<8x512xf32>
    %c0_30 = arith.constant 0 : index
    %c0_31 = arith.constant 0 : index
    %105 = vector.load %arg3[%c0_30, %c0_31] : memref<8x72xbf16, #tpu.memory_space<vmem>>, vector<8x72xbf16>
    %c0_32 = arith.constant 0 : index
    %c0_33 = arith.constant 0 : index
    %106 = vector.load %arg6[%c0_32, %c0_33] : memref<8x1xf32, #tpu.memory_space<vmem>>, vector<8x1xf32>
    %c0_34 = arith.constant 0 : index
    %c0_35 = arith.constant 0 : index
    %107 = vector.load %arg7[%c0_34, %c0_35] : memref<8x1xf32, #tpu.memory_space<vmem>>, vector<8x1xf32>
    %c16_i32_36 = arith.constant 16 : i32
    %108 = tpu.dynamic_rotate %104 by %c16_i32_36 dim 1 : vector<8x512xf32>, i32 -> vector<8x512xf32>
    %109 = vector.shape_cast %39 : vector<1x512xi1> to vector<1x512xi1>
    %110 = vector.broadcast %109 : vector<1x512xi1> to vector<8x512xi1>
    %111 = arith.select %110, %104, %108 : vector<8x512xi1>, vector<8x512xf32>
    %c496_i32_37 = arith.constant 496 : i32
    %112 = tpu.dynamic_rotate %104 by %c496_i32_37 dim 1 : vector<8x512xf32>, i32 -> vector<8x512xf32>
    %113 = vector.shape_cast %41 : vector<1x512xi1> to vector<1x512xi1>
    %114 = vector.broadcast %113 : vector<1x512xi1> to vector<8x512xi1>
    %115 = arith.select %114, %104, %112 : vector<8x512xi1>, vector<8x512xf32>
    %c1_i32_38 = arith.constant 1 : i32
    %116 = tpu.dynamic_rotate %111 by %c1_i32_38 dim 1 : vector<8x512xf32>, i32 -> vector<8x512xf32>
    %117 = vector.shape_cast %35 : vector<1x512xi1> to vector<1x512xi1>
    %118 = vector.broadcast %117 : vector<1x512xi1> to vector<8x512xi1>
    %119 = arith.select %118, %111, %116 : vector<8x512xi1>, vector<8x512xf32>
    %c511_i32_39 = arith.constant 511 : i32
    %120 = tpu.dynamic_rotate %111 by %c511_i32_39 dim 1 : vector<8x512xf32>, i32 -> vector<8x512xf32>
    %121 = vector.shape_cast %37 : vector<1x512xi1> to vector<1x512xi1>
    %122 = vector.broadcast %121 : vector<1x512xi1> to vector<8x512xi1>
    %123 = arith.select %122, %111, %120 : vector<8x512xi1>, vector<8x512xf32>
    %c1_i32_40 = arith.constant 1 : i32
    %124 = tpu.dynamic_rotate %104 by %c1_i32_40 dim 1 : vector<8x512xf32>, i32 -> vector<8x512xf32>
    %125 = vector.shape_cast %35 : vector<1x512xi1> to vector<1x512xi1>
    %126 = vector.broadcast %125 : vector<1x512xi1> to vector<8x512xi1>
    %127 = arith.select %126, %104, %124 : vector<8x512xi1>, vector<8x512xf32>
    %c511_i32_41 = arith.constant 511 : i32
    %128 = tpu.dynamic_rotate %104 by %c511_i32_41 dim 1 : vector<8x512xf32>, i32 -> vector<8x512xf32>
    %129 = vector.shape_cast %37 : vector<1x512xi1> to vector<1x512xi1>
    %130 = vector.broadcast %129 : vector<1x512xi1> to vector<8x512xi1>
    %131 = arith.select %130, %104, %128 : vector<8x512xi1>, vector<8x512xf32>
    %c1_i32_42 = arith.constant 1 : i32
    %132 = tpu.dynamic_rotate %115 by %c1_i32_42 dim 1 : vector<8x512xf32>, i32 -> vector<8x512xf32>
    %133 = vector.shape_cast %35 : vector<1x512xi1> to vector<1x512xi1>
    %134 = vector.broadcast %133 : vector<1x512xi1> to vector<8x512xi1>
    %135 = arith.select %134, %115, %132 : vector<8x512xi1>, vector<8x512xf32>
    %c511_i32_43 = arith.constant 511 : i32
    %136 = tpu.dynamic_rotate %115 by %c511_i32_43 dim 1 : vector<8x512xf32>, i32 -> vector<8x512xf32>
    %137 = vector.shape_cast %37 : vector<1x512xi1> to vector<1x512xi1>
    %138 = vector.broadcast %137 : vector<1x512xi1> to vector<8x512xi1>
    %139 = arith.select %138, %115, %136 : vector<8x512xi1>, vector<8x512xf32>
    %140 = tpu.concatenate %119, %111, %123, %127, %104, %131, %135, %115, %139 in 0 : vector<8x512xf32>, vector<8x512xf32>, vector<8x512xf32>, vector<8x512xf32>, vector<8x512xf32>, vector<8x512xf32>, vector<8x512xf32>, vector<8x512xf32>, vector<8x512xf32> -> vector<72x512xf32>
    %141 = arith.truncf %140 : vector<72x512xf32> to vector<72x512xbf16>
    %cst_44 = arith.constant dense<0.000000e+00> : vector<8x512xf32>
    %142 = tpu.matmul %105, %141, %cst_44 {dimension_numbers = #tpu.dot_dimension_numbers<[1], [0], [0], [1], [0, 0, 1, 1], [], []>} : vector<8x72xbf16>, vector<72x512xbf16>, vector<8x512xf32> -> vector<8x512xf32>
    %cst_45 = arith.constant dense<0.000000e+00> : vector<8xf32>
    %143 = vector.multi_reduction <add>, %142, %cst_45 [1] : vector<8x512xf32> to vector<8xf32>
    %144 = vector.shape_cast %143 : vector<8xf32> to vector<8x1xf32>
    %145 = arith.mulf %142, %142 : vector<8x512xf32>
    %cst_46 = arith.constant dense<0.000000e+00> : vector<8xf32>
    %146 = vector.multi_reduction <add>, %145, %cst_46 [1] : vector<8x512xf32> to vector<8xf32>
    %147 = vector.shape_cast %146 : vector<8xf32> to vector<8x1xf32>
    %cst_47 = arith.constant 0.001953125 : f32
    %148 = vector.broadcast %cst_47 : f32 to vector<8x1xf32>
    %149 = arith.mulf %144, %148 : vector<8x1xf32>
    %cst_48 = arith.constant 0.001953125 : f32
    %150 = vector.broadcast %cst_48 : f32 to vector<8x1xf32>
    %151 = arith.mulf %147, %150 : vector<8x1xf32>
    %152 = arith.mulf %149, %149 : vector<8x1xf32>
    %153 = arith.subf %151, %152 : vector<8x1xf32>
    %cst_49 = arith.constant 0.000000e+00 : f32
    %154 = vector.broadcast %cst_49 : f32 to vector<8x1xf32>
    %155 = arith.maximumf %153, %154 : vector<8x1xf32>
    %cst_50 = arith.constant 9.99999974E-6 : f32
    %156 = vector.broadcast %cst_50 : f32 to vector<8x1xf32>
    %157 = arith.addf %155, %156 : vector<8x1xf32>
    %158 = math.rsqrt %157 : vector<8x1xf32>
    %159 = arith.mulf %106, %158 : vector<8x1xf32>
    %160 = arith.mulf %149, %159 : vector<8x1xf32>
    %161 = arith.subf %107, %160 : vector<8x1xf32>
    %162 = vector.broadcast %159 : vector<8x1xf32> to vector<8x512xf32>
    %163 = arith.mulf %142, %162 : vector<8x512xf32>
    %164 = vector.broadcast %161 : vector<8x1xf32> to vector<8x512xf32>
    %165 = arith.addf %163, %164 : vector<8x512xf32>
    %166 = arith.addf %165, %0 : vector<8x512xf32>
    %cst_51 = arith.constant 0.000000e+00 : f32
    %167 = vector.broadcast %cst_51 : f32 to vector<8x512xf32>
    %168 = arith.maximumf %166, %167 : vector<8x512xf32>
    %c0_52 = arith.constant 0 : index
    %c0_53 = arith.constant 0 : index
    %169 = vector.load %arg8[%c0_52, %c0_53] : memref<8x512xf32, #tpu.memory_space<vmem>>, vector<8x512xf32>
    tpu.vector_store %arg8[%c0_52, %c0_53], %168 {strides = array<i32>} : memref<8x512xf32, #tpu.memory_space<vmem>>, vector<8x512xf32>,
    return
  }
  func.func @transform_0(%arg0: i32) -> (i32, i32) {
    %c0_i32 = arith.constant 0 : i32
    %c0_i32_0 = arith.constant 0 : i32
    %c0_i32_1 = arith.constant 0 : i32
    return %c0_i32, %c0_i32_0 : i32, i32
  }
  func.func @transform_1(%arg0: i32) -> (i32, i32) {
    %c0_i32 = arith.constant 0 : i32
    %c0_i32_0 = arith.constant 0 : i32
    %c0_i32_1 = arith.constant 0 : i32
    return %c0_i32, %c0_i32_0 : i32, i32
  }
  func.func @transform_2(%arg0: i32) -> (i32, i32) {
    %c0_i32 = arith.constant 0 : i32
    %c0_i32_0 = arith.constant 0 : i32
    %c0_i32_1 = arith.constant 0 : i32
    return %c0_i32, %c0_i32_0 : i32, i32
  }
  func.func @transform_3(%arg0: i32) -> (i32, i32) {
    %c0_i32 = arith.constant 0 : i32
    %c0_i32_0 = arith.constant 0 : i32
    %c0_i32_1 = arith.constant 0 : i32
    return %c0_i32, %c0_i32_0 : i32, i32
  }
  func.func @transform_4(%arg0: i32) -> (i32, i32) {
    %c0_i32 = arith.constant 0 : i32
    %c0_i32_0 = arith.constant 0 : i32
    %c0_i32_1 = arith.constant 0 : i32
    return %c0_i32, %c0_i32_0 : i32, i32
  }
  func.func @transform_5(%arg0: i32) -> (i32, i32) {
    %c0_i32 = arith.constant 0 : i32
    %c0_i32_0 = arith.constant 0 : i32
    %c0_i32_1 = arith.constant 0 : i32
    return %c0_i32, %c0_i32_0 : i32, i32
  }
  func.func @transform_6(%arg0: i32) -> (i32, i32) {
    %c0_i32 = arith.constant 0 : i32
    %c0_i32_0 = arith.constant 0 : i32
    %c0_i32_1 = arith.constant 0 : i32
    return %c0_i32, %c0_i32_0 : i32, i32
  }
  func.func @transform_7(%arg0: i32) -> (i32, i32) {
    %c0_i32 = arith.constant 0 : i32
    %c0_i32_0 = arith.constant 0 : i32
    %c0_i32_1 = arith.constant 0 : i32
    return %c0_i32, %c0_i32_0 : i32, i32
  }
}

</mosaic_0001>

<bundles_post_ra>
// kernel: tpu_custom_call.1
= control target key start
LH: loop header
LB: loop body
LE: loop exit
PB: predicated region body
PF: predicated region fallthrough
CT: control target
= control target key end

     0   :  { %s1613_s0 = inlined_call_operand.vmem [shape: f32[8,512], index: 0, kind: input, shape index: {}]   ;;  %s1614_s1 = inlined_call_operand.vmem [shape: bf16[8,72], index: 1, kind: input, shape index: {}]   ;;  %s1615_s2 = inlined_call_operand.vmem [shape: bf16[8,72], index: 2, kind: input, shape index: {}]   ;;  %s1616_s3 = inlined_call_operand.vmem [shape: f32[8,1], index: 3, kind: input, shape index: {}]   ;;  %s1617_s4 = inlined_call_operand.vmem [shape: f32[8,1], index: 4, kind: input, shape index: {}]   ;;  %s1618_s5 = inlined_call_operand.vmem [shape: f32[8,1], index: 5, kind: input, shape index: {}]   ;;  %s1619_s6 = inlined_call_operand.vmem [shape: f32[8,1], index: 6, kind: input, shape index: {}]   ;;  %s1620_s7 = inlined_call_operand.hbm [shape: f32[8,512], index: 7, kind: output, shape index: {}]  }
   0x1   :  { %v1044_v0 = vld [vmem:[%s1613_s0] sm:$0xff]  ;;  %v1049_v1 = vld [vmem:[%s1613_s0 + $0x18] sm:$0xff]  ;;  %v1054_v2 = vld [vmem:[%s1613_s0 + $0x8] sm:$0xff] }
   0x2   :  { %v811_v3 = vpack.i.bf16 %v1049_v1, %v1044_v0  ;;  %v1061_v4 = vld [vmem:[%s1613_s0 + $0x10] sm:$0xff] }
   0x3   :  { %12 = vsyncpa [#allocation3], 0  ;;  %v1065_v5 = vpack.i.bf16 %v1061_v4, %v1054_v2  ;;  %s995_s9 = smov 16   ;;  %s996_s10 = smov 112   ;;  %v831_v6 = vpack.i.bf16 %v1054_v2, %v1044_v0  ;;  %v32_v7 = vlaneseq  ;;  %v846_v35 = vpack.i.bf16 %v1061_v4, %v1049_v1 }
   0x4   :  { %812 = vrot.lane.b32.xlu0 %v811_v3, %s995_s9  ;;  %s997_s11 = smov 1   ;;  %s998_s12 = smov 127   ;;  %v999_v51 = vmov 0  }
   0x5   :  { %822 = vrot.lane.b32.xlu1 %v1065_v5, %s996_s10  ;;  %v1076_v8 = vand.u32 127, %v32_v7  ;;  %385 = vmatprep.mubr.bf16.mxu0 %v999_v51 }
   0x6   :  { %426 = vmatprep.mubr.bf16.mxu1 %v999_v51  ;;  %886 = vset.pattern.permute.xlu0 %v999_v51 }
   0x7   :  { %v1079_v9 = vadd.s32 256, %v1076_v8  ;;  %v41_v10 = vand.u32 255, %v1076_v8  ;;  %vm160_vm0 = vcmp.lt.s32.totalorder %v1076_v8, 16  ;;  %v36_v22 = vadd.s32 384, %v1076_v8  ;;  %887 = vset.pattern.permute.xlu1 %v999_v51 }
   0x8   :  { %817 = vrot.lane.b32.xlu0 %v1065_v5, %s995_s9  ;;  %v34_v34 = vadd.s32 128, %v1076_v8  ;;  %vm185_vm3 = vcmp.lt.s32.totalorder %v1076_v8, 112  ;;  %vm210_vm6 = vcmp.lt.s32.totalorder %v1076_v8, 1  ;;  %vm235_vm7 = vcmp.lt.s32.totalorder %v1076_v8, 127  ;;  %v481_v8 = vld [vmem:[%s1615_s2] sm:$0xf] }
   0x9   :  { %827 = vrot.lane.b32.xlu1 %v811_v3, %s996_s10  ;;  %v55_v14 = vand.u32 255, %v1079_v9  ;;  %vm1086_vm1 = vcmp.lt.s32.totalorder %v41_v10, 16  ;;  %v62_v31 = vand.u32 255, %v36_v22  ;;  %v1188_v55 = vand.u32 15, %v41_v10 }
   0xa   :  { %v48_v40 = vand.u32 255, %v34_v34 }
   0xb   :  { %vm1092_vm2 = vcmp.lt.s32.totalorder %v55_v14, 16  ;;  %vm1129_vm4 = vcmp.ge.s32.totalorder %v62_v31, 240  ;;  %v1184_v54 = vand.u32 15, %v62_v31  ;;  %v1190_v56 = vand.u32 15, %v55_v14 }
   0xc   :  { %vm1148_vm5 = vcmp.ge.s32.totalorder %v48_v40, 240  ;;  %v1182_v53 = vand.u32 15, %v48_v40  ;;  %vm133_vm10 = vcmp.eq.s32.totalorder %v1188_v55, 0  ;;  %vm1622_vm13 = vcmp.eq.s32.totalorder %v1188_v55, 15 }
   0xd   :  { %832 = vrot.lane.b32.xlu1 %v831_v6, %s997_s11  ;;  %vm136_vm9 = vcmp.eq.s32.totalorder %v1184_v54, 0  ;;  %vm1621_vm11 = vcmp.eq.s32.totalorder %v1190_v56, 0  ;;  %vm140_vm14 = vcmp.eq.s32.totalorder %v1184_v54, 15  ;;  %vm139_vm15 = vcmp.eq.s32.totalorder %v1190_v56, 15 }
   0xe   :  { %vm134_vm8 = vcmp.eq.s32.totalorder %v1182_v53, 0  ;;  %vm138_vm12 = vcmp.eq.s32.totalorder %v1182_v53, 15 }
  0x76   :  { %v813_v11 = vpop.permute.xlu0 %812 }
  0x77   :  { %v815_v12 = vunpack.i.h.bf16 %v813_v11  ;;  %v814_v13 = vunpack.i.l.bf16 %v813_v11  ;;  %v823_v15 = vpop.permute.xlu1 %822 }
  0x78   :  { %v825_v36 = vunpack.i.h.bf16 %v823_v15  ;;  %v824_v41 = vunpack.i.l.bf16 %v823_v15 }
  0x79   :  { %v164_v17 = vsel %vm160_vm0, %v815_v12, %v814_v13 }
  0x7a   :  { %v818_v18 = vpop.permute.xlu0 %817  ;;  %v1100_v24 = vsel %vm1086_vm1, %v1044_v0, %v164_v17  ;;  %v187_v46 = vsel %vm185_vm3, %v824_v41, %v825_v36 }
  0x7b   :  { %v820_v20 = vunpack.i.h.bf16 %v818_v18  ;;  %v819_v21 = vunpack.i.l.bf16 %v818_v18  ;;  %v828_v23 = vpop.permute.xlu1 %827  ;;  %v1161_v48 = vsel %vm1148_vm5, %v1054_v2, %v187_v46 }
  0x7c   :  { %v830_v32 = vunpack.i.h.bf16 %v828_v23  ;;  %v829_v33 = vunpack.i.l.bf16 %v828_v23 }
  0x7d   :  { %v1104_v25 = vsel %vm160_vm0, %v820_v20, %v815_v12  ;;  %v162_v26 = vsel %vm160_vm0, %v819_v21, %v820_v20  ;;  %v1110_v27 = vsel %vm160_vm0, %v814_v13, %v819_v21 }
  0x7e   :  { %v1115_v28 = vsel %vm1092_vm2, %v1061_v4, %v162_v26  ;;  %v836_v29 = vpack.i.bf16 %v1110_v27, %v1100_v24  ;;  %v189_v39 = vsel %vm185_vm3, %v830_v32, %v829_v33  ;;  %v1139_v42 = vsel %vm185_vm3, %v825_v36, %v830_v32 }
  0x7f   :  { %v841_v30 = vpack.i.bf16 %v1115_v28, %v1104_v25  ;;  %v851_v37 = vpack.i.bf16 %v1115_v28, %v1110_v27  ;;  %v1144_v43 = vsel %vm1129_vm4, %v1049_v1, %v189_v39  ;;  %v856_v44 = vpack.i.bf16 %v1104_v25, %v1100_v24  ;;  %v833_v52 = vpop.permute.xlu1 %832 }
  0x80   :  { %837 = vrot.lane.b32.xlu0 %v836_v29, %s997_s11  ;;  %v876_v47 = vpack.i.bf16 %v1139_v42, %v1144_v43  ;;  %v1165_v49 = vsel %vm185_vm3, %v829_v33, %v824_v41  ;;  %v835_v57 = vunpack.i.h.bf16 %v833_v52  ;;  %v834_v58 = vunpack.i.l.bf16 %v833_v52 }
  0x81   :  { %842 = vrot.lane.b32.xlu1 %v841_v30, %s997_s11  ;;  %v871_v50 = vpack.i.bf16 %v1161_v48, %v1165_v49 }
  0x84   :  { %852 = vrot.lane.b32.xlu0 %v851_v37, %s998_s12 }
  0x85   :  { %847 = vrot.lane.b32.xlu1 %v846_v35, %s997_s11 }
  0x88   :  { %857 = vrot.lane.b32.xlu0 %v856_v44, %s998_s12 }
  0x89   :  { %867 = vrot.lane.b32.xlu1 %v811_v3, %s998_s12 }
  0x8c   :  { %862 = vrot.lane.b32.xlu0 %v1065_v5, %s998_s12  ;;  %v262_v5 = vsel %vm210_vm6, %v834_v58, %v835_v57 }
  0x8d   :  { %877 = vrot.lane.b32.xlu1 %v876_v47, %s997_s11  ;;  %v265_v31 = vsel %vm134_vm8, %v1054_v2, %v262_v5 }
  0x90   :  { %872 = vrot.lane.b32.xlu0 %v871_v50, %s997_s11 }
  0x91   :  { %304 = vrot.lane.b32.xlu1 %v1139_v42, %s998_s12 }
  0x94   :  { %882 = vrot.lane.b32.xlu0 %v871_v50, %s998_s12 }
  0x98   :  { %306 = vrot.lane.b32.xlu0 %v1144_v43, %s998_s12 }
  0xf2   :  { %v838_v59 = vpop.permute.xlu0 %837 }
  0xf3   :  { %v840_v60 = vunpack.i.h.bf16 %v838_v59  ;;  %v839_v61 = vunpack.i.l.bf16 %v838_v59  ;;  %v843_v62 = vpop.permute.xlu1 %842 }
  0xf4   :  { %v845_v63 = vunpack.i.h.bf16 %v843_v62  ;;  %v844_v3 = vunpack.i.l.bf16 %v843_v62 }
  0xf5   :  { %v213_v6 = vsel %vm210_vm6, %v839_v61, %v840_v60 }
  0xf6   :  { %v853_v7 = vpop.permute.xlu0 %852  ;;  %v224_v9 = vsel %vm134_vm8, %v1110_v27, %v213_v6  ;;  %v211_v10 = vsel %vm210_vm6, %v845_v63, %v844_v3  ;;  %v214_v11 = vsel %vm210_vm6, %v844_v3, %v839_v61  ;;  %v212_v12 = vsel %vm210_vm6, %v840_v60, %v845_v63 }
  0xf7   :  { %v855_v13 = vunpack.i.h.bf16 %v853_v7  ;;  %v854_v14 = vunpack.i.l.bf16 %v853_v7  ;;  %v848_v15 = vpop.permute.xlu1 %847  ;;  %v317_v17 = vpack.c.bf16 %v1110_v27, %v224_v9  ;;  %v226_v18 = vsel %vm136_vm9, %v1104_v25, %v211_v10 }
  0xf8   :  { %v850_v20 = vunpack.i.h.bf16 %v848_v15  ;;  %v849_v21 = vunpack.i.l.bf16 %v848_v15  ;;  %v319_v22 = vpack.c.bf16 %v1104_v25, %v226_v18  ;;  %v223_v23 = vsel %vm133_vm10, %v1100_v24, %v214_v11 }
  0xf9   :  { %v237_v26 = vsel %vm235_vm7, %v854_v14, %v855_v13  ;;  %353 = vmatprep.subr.bf16.mxu0 %v317_v17  ;;  %v316_v29 = vpack.c.bf16 %v1100_v24, %v223_v23  ;;  %v225_v30 = vsel %vm1621_vm11, %v1115_v28, %v212_v12 }
  0xfa   :  { %v261_v32 = vsel %vm210_vm6, %v835_v57, %v850_v20  ;;  %v260_v33 = vsel %vm210_vm6, %v850_v20, %v849_v21  ;;  %v263_v34 = vsel %vm210_vm6, %v849_v21, %v834_v58  ;;  %394 = vmatprep.subr.bf16.mxu1 %v319_v22  ;;  %v858_v35 = vpop.permute.xlu0 %857  ;;  %v318_v36 = vpack.c.bf16 %v1115_v28, %v225_v30 }
  0xfb   :  { %v860_v37 = vunpack.i.h.bf16 %v858_v35  ;;  %v859_v39 = vunpack.i.l.bf16 %v858_v35  ;;  %354 = vmatpush1.bf16.msra.mxu0 %v316_v29  ;;  %v868_v40 = vpop.permute.xlu1 %867  ;;  %v249_v41 = vsel %vm138_vm12, %v1110_v27, %v237_v26  ;;  %v264_v44 = vsel %vm133_vm10, %v1044_v0, %v263_v34 }
  0xfc   :  { %v870_v46 = vunpack.i.h.bf16 %v868_v40  ;;  %v869_v47 = vunpack.i.l.bf16 %v868_v40  ;;  %395 = vmatpush1.bf16.msra.mxu1 %v318_v36  ;;  %v321_v50 = vpack.c.bf16 %v265_v31, %v249_v41  ;;  %v267_v52 = vsel %vm136_vm9, %v1049_v1, %v260_v33 }
  0xfd   :  { %v236_v57 = vsel %vm235_vm7, %v855_v13, %v860_v37  ;;  %v238_v58 = vsel %vm235_vm7, %v859_v39, %v854_v14  ;;  %v239_v27 = vsel %vm235_vm7, %v860_v37, %v859_v39  ;;  %v266_v59 = vsel %vm1621_vm11, %v1061_v4, %v261_v32 }
  0xfe   :  { %v279_v60 = vsel %vm235_vm7, %v870_v46, %v869_v47  ;;  %355 = vmatprep.subr.bf16.mxu0 %v321_v50  ;;  %v863_v61 = vpop.permute.xlu0 %862  ;;  %v248_v62 = vsel %vm1622_vm13, %v1100_v24, %v238_v58  ;;  %v251_v63 = vsel %vm140_vm14, %v1104_v25, %v239_v27  ;;  %v250_v3 = vsel %vm139_vm15, %v1115_v28, %v236_v57 }
  0xff   :  { %v865_v5 = vunpack.i.h.bf16 %v863_v61  ;;  %v864_v6 = vunpack.i.l.bf16 %v863_v61  ;;  %v878_v7 = vpop.permute.xlu1 %877  ;;  %v320_v9 = vpack.c.bf16 %v264_v44, %v248_v62  ;;  %v323_v10 = vpack.c.bf16 %v267_v52, %v251_v63 }
 0x100   :  { %v880_v11 = vunpack.i.h.bf16 %v878_v7  ;;  %v879_v12 = vunpack.i.l.bf16 %v878_v7  ;;  %v322_v13 = vpack.c.bf16 %v266_v59, %v250_v3  ;;  %v283_v24 = vsel %vm140_vm14, %v1049_v1, %v279_v60 }
 0x101   :  { %v276_v14 = vsel %vm235_vm7, %v865_v5, %v870_v46  ;;  %v277_v25 = vsel %vm235_vm7, %v864_v6, %v865_v5  ;;  %v278_v28 = vsel %vm235_vm7, %v869_v47, %v864_v6  ;;  %356 = vmatpush1.bf16.msra.mxu0 %v320_v9  ;;  %396 = vmatprep.subr.bf16.mxu1 %v323_v10  ;;  %v149_v5 = vld [vmem:[%s1614_s1] sm:$0xf] }
 0x102   :  { %v292_v15 = vsel %vm210_vm6, %v880_v11, %v879_v12  ;;  %v873_v17 = vpop.permute.xlu0 %872  ;;  %397 = vmatpush1.bf16.msra.mxu1 %v322_v13  ;;  %v281_v18 = vsel %vm138_vm12, %v1054_v2, %v277_v25  ;;  %v327_v20 = vpack.c.bf16 %v283_v24, %v1049_v1  ;;  %v280_v21 = vsel %vm1622_vm13, %v1044_v0, %v278_v28 }
 0x103   :  { %v875_v22 = vunpack.i.h.bf16 %v873_v17  ;;  %v874_v23 = vunpack.i.l.bf16 %v873_v17  ;;  %v325_v26 = vpack.c.bf16 %v281_v18, %v1054_v2  ;;  %v324_v29 = vpack.c.bf16 %v280_v21, %v1044_v0  ;;  %v305_v44 = vpop.permute.xlu1 %304 }
 0x104   :  { %398 = vmatprep.subr.bf16.mxu1 %v327_v20  ;;  %v282_v30 = vsel %vm139_vm15, %v1061_v4, %v276_v14  ;;  %v299_v31 = vsel %vm136_vm9, %v1144_v43, %v292_v15 }
 0x105   :  { %v293_v1 = vsel %vm210_vm6, %v875_v22, %v880_v11  ;;  %v294_v32 = vsel %vm210_vm6, %v874_v23, %v875_v22  ;;  %v295_v2 = vsel %vm210_vm6, %v879_v12, %v874_v23  ;;  %357 = vmatprep.subr.bf16.mxu0 %v325_v26  ;;  %v326_v0 = vpack.c.bf16 %v282_v30, %v1061_v4 }
 0x106   :  { %v883_v33 = vpop.permute.xlu0 %882  ;;  %358 = vmatpush1.bf16.msra.mxu0 %v324_v29  ;;  %v331_v34 = vpack.c.bf16 %v1144_v43, %v299_v31  ;;  %v297_v35 = vsel %vm134_vm8, %v1161_v48, %v294_v32  ;;  %v296_v36 = vsel %vm133_vm10, %v1165_v49, %v295_v2  ;;  %v298_v37 = vsel %vm1621_vm11, %v1139_v42, %v293_v1  ;;  %v150_v2 = vld [vmem:[%s1616_s3] sm:$0xff] }
 0x107   :  { %v885_v39 = vunpack.i.h.bf16 %v883_v33  ;;  %v884_v40 = vunpack.i.l.bf16 %v883_v33  ;;  %399 = vmatpush1.bf16.msra.mxu1 %v326_v0  ;;  %v329_v4 = vpack.c.bf16 %v1161_v48, %v297_v35  ;;  %v328_v41 = vpack.c.bf16 %v1165_v49, %v296_v36 }
 0x108   :  { %400 = vmatprep.subr.bf16.mxu1 %v331_v34  ;;  %v330_v46 = vpack.c.bf16 %v1139_v42, %v298_v37  ;;  %vm340_vm11 = vcmask 1043456   ;;  %v151_v34 = vld [vmem:[%s1617_s4] sm:$0xff] }
 0x109   :  { %v309_v47 = vsel %vm235_vm7, %v885_v39, %v305_v44  ;;  %359 = vmatprep.subr.bf16.mxu0 %v329_v4  ;;  %v310_v50 = vsel %vm235_vm7, %v884_v40, %v885_v39 }
 0x10a   :  { %v307_v52 = vpop.permute.xlu0 %306  ;;  %360 = vmatpush1.bf16.msra.mxu0 %v328_v41  ;;  %v313_v57 = vsel %vm138_vm12, %v1161_v48, %v309_v47  ;;  %v312_v58 = vsel %vm1622_vm13, %v1165_v49, %v310_v50  ;;  %vm336_vm13 = vcmask 588800  }
 0x10b   :  { %v308_v27 = vsel %vm235_vm7, %v305_v44, %v307_v52  ;;  %v311_v59 = vsel %vm235_vm7, %v307_v52, %v884_v40  ;;  %401 = vmatpush1.bf16.msra.mxu1 %v330_v46  ;;  %v333_v60 = vpack.c.bf16 %v313_v57, %v313_v57  ;;  %v332_v61 = vpack.c.bf16 %v312_v58, %v312_v58 }
 0x10c   :  { %v315_v62 = vsel %vm140_vm14, %v1144_v43, %v311_v59  ;;  %v314_v48 = vsel %vm139_vm15, %v1139_v42, %v308_v27 }
 0x10d   :  { %v335_v63 = vpack.c.bf16 %v315_v62, %v315_v62  ;;  %797 = vmatprep.subr.msk.bf16.mxu0 %vm340_vm11, %v333_v60  ;;  %v342_v49 = vsel %vm340_vm11, %v332_v61, 0  ;;  %v334_v3 = vpack.c.bf16 %v314_v48, %v314_v48 }
 0x10e   :  { %362 = vmatpush1.bf16.msra.mxu0 %v342_v49 }
 0x10f   :  { %799 = vmatprep.subr.msk.bf16.mxu1 %vm340_vm11, %v335_v63  ;;  %v348_v43 = vsel %vm340_vm11, %v334_v3, 0 }
 0x110   :  { %403 = vmatpush1.bf16.msra.mxu1 %v348_v43 }
 0x111   :  { %798 = vmatmul.mubr.msk.bf16.vlgmr.msra.gmra.mrb[0].mxu0 %vm336_vm13, %v149_v5 }
 0x112   :  { %679 = vmatprep.mubr.bf16.mxu0 %v999_v51 }
 0x113   :  { %800 = vmatmul.mubr.msk.bf16.vlgmr.msra.gmra.mrb[0].mxu1 %vm336_vm13, %v149_v5 }
 0x114   :  { %720 = vmatprep.mubr.bf16.mxu1 %v999_v51 }
 0x1e4   :  { %v387_v42 = vpop.f32.mrb[0].mxu0 }
 0x1e5   :  { %v440_v6 = vmul.f32 %v387_v42, %v387_v42  ;;  %v389_v7 = vpop.f32.mrb[1].mxu0 }
 0x1e6   :  { %v435_v9 = vadd.f32 %v389_v7, %v387_v42  ;;  %v441_v10 = vmul.f32 %v389_v7, %v389_v7  ;;  %v391_v11 = vpop.f32.mrb[2].mxu0  ;;  %v428_v12 = vpop.f32.mrb[0].mxu1 }
 0x1e7   :  { %v442_v13 = vmul.f32 %v428_v12, %v428_v12  ;;  %v392_v24 = vpop.f32.mrb[3].mxu0  ;;  %v430_v14 = vpop.f32.mrb[1].mxu1 }
 0x1e8   :  { %v432_v25 = vpop.f32.mrb[2].mxu1  ;;  %v436_v28 = vadd.f32 %v435_v9, %v428_v12  ;;  %v444_v15 = vadd.f32 %v441_v10, %v440_v6  ;;  %v443_v20 = vmul.f32 %v430_v14, %v430_v14 }
 0x1e9   :  { %v433_v17 = vpop.f32.mrb[3].mxu1 }
 0x1ea   :  { %v437_v18 = vadd.f32 %v436_v28, %v430_v14  ;;  %v445_v21 = vadd.f32 %v444_v15, %v442_v13 }
 0x1ec   :  { %438 = vadd.xlane.f32.xlu1 %v437_v18  ;;  %v446_v22 = vadd.f32 %v445_v21, %v443_v20 }
 0x1ee   :  { %447 = vadd.xlane.f32.xlu0 %v446_v22 }
 0x279   :  { %v439_v51 = vpop.xlane.xlu1 %438 }
 0x27a   :  { %v449_v23 = vmul.f32 0.001953125, %v439_v51 }
 0x27b   :  { %v448_v26 = vpop.xlane.xlu0 %447 }
 0x27c   :  { %v451_v29 = vmul.f32 %v449_v23, %v449_v23  ;;  %v450_v30 = vmul.f32 0.001953125, %v448_v26 }
 0x27e   :  { %v452_v31 = vsub.f32 %v450_v30, %v451_v29 }
 0x280   :  { %v453_v1 = vmax.f32 %v452_v31, 0.0 }
 0x282   :  { %v454_v32 = vadd.f32 1e-05, %v453_v1 }
 0x284   :  { %963 = vrsqrt.f32 %v454_v32 }
 0x28e   :  { %v964_v0 = vpop.eup %963 }
 0x28f   :  { %v456_v33 = vmul.f32 %v964_v0, %v150_v2 }
 0x291   :  { %461 = vperm.xlu0 %886, %v456_v33   ;;  %v457_v35 = vmul.f32 %v456_v33, %v449_v23 }
 0x293   :  { %v458_v36 = vsub.f32 %v151_v34, %v457_v35 }
 0x295   :  { %470 = vperm.xlu1 %887, %v458_v36  }
 0x310   :  { %v462_v37 = vpop.permute.xlu0 %461 }
 0x311   :  { %v464_v39 = vmul.f32 %v462_v37, %v387_v42  ;;  %v465_v40 = vmul.f32 %v462_v37, %v389_v7  ;;  %v466_v4 = vmul.f32 %v462_v37, %v428_v12  ;;  %v467_v41 = vmul.f32 %v462_v37, %v430_v14 }
 0x314   :  { %v471_v44 = vpop.permute.xlu1 %470 }
 0x315   :  { %v473_v46 = vadd.f32 %v471_v44, %v464_v39  ;;  %v474_v47 = vadd.f32 %v471_v44, %v465_v40  ;;  %v475_v50 = vadd.f32 %v471_v44, %v466_v4  ;;  %v476_v52 = vadd.f32 %v471_v44, %v467_v41 }
 0x317   :  { %v1351_v57 = vmax.f32 %v473_v46, 0.0  ;;  %v1353_v58 = vmax.f32 %v474_v47, 0.0  ;;  %v1355_v27 = vmax.f32 %v476_v52, 0.0  ;;  %v1357_v59 = vmax.f32 %v475_v50, 0.0 }
 0x319   :  { %v908_v60 = vpack.i.bf16 %v1353_v58, %v1351_v57  ;;  %v888_v61 = vpack.i.bf16 %v1355_v27, %v1351_v57  ;;  %v913_v62 = vpack.i.bf16 %v1357_v59, %v1355_v27  ;;  %v893_v48 = vpack.i.bf16 %v1357_v59, %v1353_v58 }
 0x31b   :  { %909 = vrot.lane.b32.xlu0 %v908_v60, %s997_s11  ;;  %889 = vrot.lane.b32.xlu1 %v888_v61, %s995_s9 }
 0x31f   :  { %914 = vrot.lane.b32.xlu0 %v913_v62, %s997_s11  ;;  %894 = vrot.lane.b32.xlu1 %v893_v48, %s995_s9 }
 0x323   :  { %944 = vrot.lane.b32.xlu0 %v888_v61, %s998_s12  ;;  %899 = vrot.lane.b32.xlu1 %v893_v48, %s996_s10 }
 0x327   :  { %904 = vrot.lane.b32.xlu1 %v888_v61, %s996_s10 }
 0x38d   :  { %v890_v63 = vpop.permute.xlu1 %889  ;;  %v910_v30 = vpop.permute.xlu0 %909 }
 0x38e   :  { %v892_v49 = vunpack.i.h.bf16 %v890_v63  ;;  %v891_v3 = vunpack.i.l.bf16 %v890_v63  ;;  %v912_v0 = vunpack.i.h.bf16 %v910_v30  ;;  %v911_v33 = vunpack.i.l.bf16 %v910_v30 }
 0x390   :  { %v495_v6 = vsel %vm160_vm0, %v892_v49, %v891_v3  ;;  %v558_v44 = vsel %vm210_vm6, %v911_v33, %v912_v0 }
 0x391   :  { %v895_v5 = vpop.permute.xlu1 %894  ;;  %v1385_v11 = vsel %vm1086_vm1, %v1351_v57, %v495_v6  ;;  %v915_v31 = vpop.permute.xlu0 %914 }
 0x392   :  { %v897_v43 = vunpack.i.h.bf16 %v895_v5  ;;  %v896_v42 = vunpack.i.l.bf16 %v895_v5  ;;  %v917_v4 = vunpack.i.h.bf16 %v915_v31  ;;  %v916_v41 = vunpack.i.l.bf16 %v915_v31 }
 0x394   :  { %v493_v7 = vsel %vm160_vm0, %v896_v42, %v897_v43  ;;  %v1380_v9 = vsel %vm160_vm0, %v891_v3, %v896_v42  ;;  %v1391_v13 = vsel %vm160_vm0, %v897_v43, %v892_v49  ;;  %v556_v42 = vsel %vm210_vm6, %v917_v4, %v916_v41 }
 0x395   :  { %v900_v10 = vpop.permute.xlu1 %899  ;;  %v918_v12 = vpack.i.bf16 %v1380_v9, %v1385_v11  ;;  %v1396_v24 = vsel %vm1092_vm2, %v1357_v59, %v493_v7  ;;  %v933_v51 = vpack.i.bf16 %v1391_v13, %v1385_v11  ;;  %v945_v36 = vpop.permute.xlu0 %944  ;;  %v557_v6 = vsel %vm210_vm6, %v912_v0, %v917_v4 }
 0x396   :  { %v902_v25 = vunpack.i.h.bf16 %v900_v10  ;;  %v923_v15 = vpack.i.bf16 %v1396_v24, %v1391_v13  ;;  %v928_v21 = vpack.i.bf16 %v1396_v24, %v1380_v9  ;;  %v901_v22 = vunpack.i.l.bf16 %v900_v10 }
 0x397   :  { %919 = vrot.lane.b32.xlu1 %v918_v12, %s997_s11  ;;  %v947_v52 = vunpack.i.h.bf16 %v945_v36  ;;  %v946_v60 = vunpack.i.l.bf16 %v945_v36  ;;  %vm1631_vm0 = vcmp.eq.s32.totalorder %v1190_v56, 0  ;;  %v561_v10 = vsel %vm134_vm8, %v1353_v58, %v558_v44 }
 0x398   :  { %v509_v38 = vsel %vm185_vm3, %v901_v22, %v902_v25  ;;  %v559_v12 = vsel %vm210_vm6, %v916_v41, %v911_v33  ;;  %vm1632_vm1 = vmmov %vm1631_vm0  ;;  %vm1633_vm2 = vcmp.eq.s32.totalorder %v1188_v55, 15 }
 0x399   :  { %v905_v14 = vpop.permute.xlu1 %904  ;;  %v1434_v26 = vsel %vm1148_vm5, %v1353_v58, %v509_v38  ;;  %v560_v38 = vsel %vm133_vm10, %v1351_v57, %v559_v12  ;;  %v562_v30 = vsel %vm1632_vm1, %v1357_v59, %v557_v6  ;;  %vm1636_vm5 = vmmov %vm1633_vm2 }
 0x39a   :  { %v907_v28 = vunpack.i.h.bf16 %v905_v14  ;;  %v906_v16 = vunpack.i.l.bf16 %v905_v14 }
 0x39b   :  { %924 = vrot.lane.b32.xlu1 %v923_v15, %s997_s11 }
 0x39c   :  { %v1403_v17 = vsel %vm185_vm3, %v902_v25, %v907_v28  ;;  %v511_v18 = vsel %vm185_vm3, %v907_v28, %v906_v16  ;;  %v1428_v23 = vsel %vm185_vm3, %v906_v16, %v901_v22  ;;  %v575_v28 = vsel %vm235_vm7, %v947_v52, %v946_v60  ;;  %vm1634_vm3 = vmmov %vm1633_vm2 }
 0x39d   :  { %v1410_v19 = vsel %vm1129_vm4, %v1355_v27, %v511_v18  ;;  %v948_v29 = vpack.i.bf16 %v1434_v26, %v1428_v23  ;;  %vm1635_vm4 = vmmov %vm1631_vm0 }
 0x39e   :  { %v953_v20 = vpack.i.bf16 %v1403_v17, %v1410_v19 }
 0x39f   :  { %929 = vrot.lane.b32.xlu1 %v928_v21, %s998_s12 }
 0x3a0   :  { %954 = vrot.lane.b32.xlu0 %v953_v20, %s997_s11 }
 0x3a3   :  { %934 = vrot.lane.b32.xlu1 %v933_v51, %s998_s12 }
 0x3a4   :  { %600 = vrot.lane.b32.xlu0 %v1403_v17, %s998_s12 }
 0x3a7   :  { %939 = vrot.lane.b32.xlu1 %v893_v48, %s998_s12 }
 0x3ab   :  { %949 = vrot.lane.b32.xlu1 %v948_v29, %s997_s11 }
 0x3af   :  { %959 = vrot.lane.b32.xlu1 %v948_v29, %s998_s12  ;;  %v563_v29 = vsel %vm136_vm9, %v1355_v27, %v556_v42 }
 0x3b3   :  { %602 = vrot.lane.b32.xlu1 %v1410_v19, %s998_s12 }
 0x409   :  { %v920_v1 = vpop.permute.xlu1 %919 }
 0x40a   :  { %v922_v32 = vunpack.i.h.bf16 %v920_v1  ;;  %v921_v2 = vunpack.i.l.bf16 %v920_v1 }
 0x40c   :  { %v526_v45 = vsel %vm210_vm6, %v921_v2, %v922_v32 }
 0x40d   :  { %v925_v34 = vpop.permute.xlu1 %924  ;;  %v529_v35 = vsel %vm134_vm8, %v1380_v9, %v526_v45 }
 0x40e   :  { %v927_v37 = vunpack.i.h.bf16 %v925_v34  ;;  %v926_v39 = vunpack.i.l.bf16 %v925_v34  ;;  %v613_v40 = vpack.c.bf16 %v1380_v9, %v529_v35 }
 0x410   :  { %v524_v46 = vsel %vm210_vm6, %v927_v37, %v926_v39  ;;  %v525_v47 = vsel %vm210_vm6, %v922_v32, %v927_v37  ;;  %v527_v50 = vsel %vm210_vm6, %v926_v39, %v921_v2  ;;  %647 = vmatprep.subr.bf16.mxu0 %v613_v40  ;;  %v579_v32 = vsel %vm140_vm14, %v1355_v27, %v575_v28 }
 0x411   :  { %v930_v61 = vpop.permute.xlu1 %929  ;;  %v528_v62 = vsel %vm133_vm10, %v1385_v11, %v527_v50  ;;  %v531_v48 = vsel %vm136_vm9, %v1391_v13, %v524_v46  ;;  %v530_v7 = vsel %vm1631_vm0, %v1396_v24, %v525_v47  ;;  %v623_v4 = vpack.c.bf16 %v579_v32, %v1355_v27 }
 0x412   :  { %v932_v63 = vunpack.i.h.bf16 %v930_v61  ;;  %v931_v49 = vunpack.i.l.bf16 %v930_v61  ;;  %v955_v3 = vpop.permute.xlu0 %954  ;;  %v612_v5 = vpack.c.bf16 %v1385_v11, %v528_v62  ;;  %v615_v43 = vpack.c.bf16 %v1391_v13, %v531_v48 }
 0x413   :  { %v614_v25 = vpack.c.bf16 %v1396_v24, %v530_v7  ;;  %v957_v16 = vunpack.i.h.bf16 %v955_v3  ;;  %v956_v15 = vunpack.i.l.bf16 %v955_v3 }
 0x414   :  { %v541_v14 = vsel %vm235_vm7, %v931_v49, %v932_v63  ;;  %648 = vmatpush1.bf16.msra.mxu0 %v612_v5  ;;  %688 = vmatprep.subr.bf16.mxu1 %v615_v43 }
 0x415   :  { %v935_v18 = vpop.permute.xlu1 %934  ;;  %v545_v20 = vsel %vm138_vm12, %v1380_v9, %v541_v14  ;;  %689 = vmatpush1.bf16.msra.mxu1 %v614_v25  ;;  %v588_v2 = vsel %vm210_vm6, %v957_v16, %v956_v15 }
 0x416   :  { %v937_v21 = vunpack.i.h.bf16 %v935_v18  ;;  %v936_v22 = vunpack.i.l.bf16 %v935_v18  ;;  %v617_v51 = vpack.c.bf16 %v561_v10, %v545_v20  ;;  %v595_v47 = vsel %vm136_vm9, %v1410_v19, %v588_v2  ;;  %v601_v10 = vpop.permute.xlu0 %600 }
 0x417   :  { %v627_v3 = vpack.c.bf16 %v1410_v19, %v595_v47 }
 0x418   :  { %v540_v31 = vsel %vm235_vm7, %v932_v63, %v937_v21  ;;  %v542_v9 = vsel %vm235_vm7, %v936_v22, %v931_v49  ;;  %v543_v1 = vsel %vm235_vm7, %v937_v21, %v936_v22  ;;  %649 = vmatprep.subr.bf16.mxu0 %v617_v51 }
 0x419   :  { %v940_v0 = vpop.permute.xlu1 %939  ;;  %v544_v33 = vsel %vm1633_vm2, %v1385_v11, %v542_v9  ;;  %v547_v45 = vsel %vm140_vm14, %v1391_v13, %v543_v1  ;;  %v546_v34 = vsel %vm139_vm15, %v1396_v24, %v540_v31 }
 0x41a   :  { %v942_v35 = vunpack.i.h.bf16 %v940_v0  ;;  %v941_v36 = vunpack.i.l.bf16 %v940_v0  ;;  %v616_v37 = vpack.c.bf16 %v560_v38, %v544_v33  ;;  %v619_v39 = vpack.c.bf16 %v563_v29, %v547_v45 }
 0x41b   :  { %v618_v40 = vpack.c.bf16 %v562_v30, %v546_v34 }
 0x41c   :  { %v572_v41 = vsel %vm235_vm7, %v942_v35, %v947_v52  ;;  %v573_v11 = vsel %vm235_vm7, %v941_v36, %v942_v35  ;;  %v574_v13 = vsel %vm235_vm7, %v946_v60, %v941_v36  ;;  %650 = vmatpush1.bf16.msra.mxu0 %v616_v37  ;;  %690 = vmatprep.subr.bf16.mxu1 %v619_v39 }
 0x41d   :  { %v950_v44 = vpop.permute.xlu1 %949  ;;  %691 = vmatpush1.bf16.msra.mxu1 %v618_v40  ;;  %v577_v24 = vsel %vm138_vm12, %v1353_v58, %v573_v11  ;;  %v576_v27 = vsel %vm1634_vm3, %v1351_v57, %v574_v13  ;;  %v578_v46 = vsel %vm139_vm15, %v1357_v59, %v572_v41 }
 0x41e   :  { %v952_v50 = vunpack.i.h.bf16 %v950_v44  ;;  %v951_v52 = vunpack.i.l.bf16 %v950_v44  ;;  %692 = vmatprep.subr.bf16.mxu1 %v623_v4  ;;  %v621_v60 = vpack.c.bf16 %v577_v24, %v1353_v58  ;;  %v620_v61 = vpack.c.bf16 %v576_v27, %v1351_v57  ;;  %v482_v27 = vld [vmem:[%s1618_s5] sm:$0xff]  ;;  %s1000_s5 = smov [#allocation2]  }
 0x41f   :  { %v622_v62 = vpack.c.bf16 %v578_v46, %v1357_v59  ;;  %s789_s21 = sshll.u32 %s1000_s5, 4  ;;  %s790_s21 = int_to_ptr.vmem [resolvable:$true] %s789_s21 }
 0x420   :  { %v589_v48 = vsel %vm210_vm6, %v952_v50, %v957_v16  ;;  %v590_v63 = vsel %vm210_vm6, %v951_v52, %v952_v50  ;;  %v591_v49 = vsel %vm210_vm6, %v956_v15, %v951_v52  ;;  %651 = vmatprep.subr.bf16.mxu0 %v621_v60  ;;  %v483_v50 = vld [vmem:[%s1619_s6] sm:$0xff]  ;;  %s971_s29 = scalar_lea.vmem %s790_s21, 512  ;;  %p976_p1 = scmp.lt.s32.totalorder %s790_s21, %s790_s21 }
 0x421   :  { %v960_v5 = vpop.permute.xlu1 %959  ;;  %652 = vmatpush1.bf16.msra.mxu0 %v620_v61  ;;  %693 = vmatpush1.bf16.msra.mxu1 %v622_v62  ;;  %v593_v57 = vsel %vm134_vm8, %v1434_v26, %v590_v63  ;;  %v592_v58 = vsel %vm133_vm10, %v1428_v23, %v591_v49  ;;  %v594_v59 = vsel %vm1635_vm4, %v1403_v17, %v589_v48  ;;  %p972_p0 = scmp.ne.s32.totalorder %s790_s21, %s971_s29  ;;  %p977_p2 = scmp.lt.s32.totalorder %s971_s29, %s971_s29 }
 0x422   :  { %v962_v43 = vunpack.i.h.bf16 %v960_v5  ;;  %v961_v42 = vunpack.i.l.bf16 %v960_v5  ;;  %694 = vmatprep.subr.bf16.mxu1 %v627_v3  ;;  %v625_v6 = vpack.c.bf16 %v1434_v26, %v593_v57  ;;  %v624_v7 = vpack.c.bf16 %v1428_v23, %v592_v58 }
 0x423   :  { %v626_v12 = vpack.c.bf16 %v1403_v17, %v594_v59  ;;  %p978_p3 = por %p977_p2, %p976_p1 }
 0x424   :  { %v605_v14 = vsel %vm235_vm7, %v962_v43, %v601_v10  ;;  %v606_v25 = vsel %vm235_vm7, %v961_v42, %v962_v43  ;;  %653 = vmatprep.subr.bf16.mxu0 %v625_v6  ;;  %v967_v43 = vld [vmem:[%s1613_s0] sm:$0xff]  ;;  %v968_v6 = vld [vmem:[%s1613_s0 + $0x8] sm:$0xff] }
 0x425   :  { %v603_v28 = vpop.permute.xlu1 %602  ;;  %654 = vmatpush1.bf16.msra.mxu0 %v624_v7  ;;  %695 = vmatpush1.bf16.msra.mxu1 %v626_v12  ;;  %v609_v16 = vsel %vm138_vm12, %v1434_v26, %v605_v14  ;;  %v608_v15 = vsel %vm1636_vm5, %v1428_v23, %v606_v25  ;;  %v970_v14 = vld [vmem:[%s1613_s0 + $0x18] sm:$0xff]  ;;  %p979_p4 = pnand %p978_p3, %p972_p0 }
 0x426   :  { %v604_v18 = vsel %vm235_vm7, %v601_v10, %v603_v28  ;;  %v607_v20 = vsel %vm235_vm7, %v603_v28, %v961_v42  ;;  %v629_v21 = vpack.c.bf16 %v609_v16, %v609_v16  ;;  %v628_v22 = vpack.c.bf16 %v608_v15, %v608_v15  ;;  %v969_v10 = vld [vmem:[%s1613_s0 + $0x10] sm:$0xff] }
 0x427   :  { %v610_v51 = vsel %vm139_vm15, %v1403_v17, %v604_v18  ;;  %v611_v53 = vsel %vm140_vm14, %v1410_v19, %v607_v20 }
 0x428   :  { %v630_v26 = vpack.c.bf16 %v610_v51, %v610_v51  ;;  %v631_v38 = vpack.c.bf16 %v611_v53, %v611_v53  ;;  %801 = vmatprep.subr.msk.bf16.mxu0 %vm340_vm11, %v629_v21  ;;  %v636_v55 = vsel %vm340_vm11, %v628_v22, 0 }
 0x429   :  { %656 = vmatpush1.bf16.msra.mxu0 %v636_v55 }
 0x42a   :  { %803 = vmatprep.subr.msk.bf16.mxu1 %vm340_vm11, %v631_v38  ;;  %v642_v56 = vsel %vm340_vm11, %v630_v26, 0 }
 0x42b   :  { %697 = vmatpush1.bf16.msra.mxu1 %v642_v56 }
 0x42c   :  { %802 = vmatmul.mubr.msk.bf16.vlgmr.msra.gmra.mrb[4].mxu0 %vm336_vm13, %v481_v8 }
 0x42e   :  { %804 = vmatmul.mubr.msk.bf16.vlgmr.msra.gmra.mrb[4].mxu1 %vm336_vm13, %v481_v8 }
 0x4ff   :  { %v681_v54 = vpop.f32.mrb[4].mxu0 }
 0x500   :  { %v734_v17 = vmul.f32 %v681_v54, %v681_v54  ;;  %v683_v19 = vpop.f32.mrb[5].mxu0 }
 0x501   :  { %v729_v23 = vadd.f32 %v683_v19, %v681_v54  ;;  %v735_v29 = vmul.f32 %v683_v19, %v683_v19  ;;  %v685_v30 = vpop.f32.mrb[6].mxu0  ;;  %v722_v31 = vpop.f32.mrb[4].mxu1 }
 0x502   :  { %v736_v9 = vmul.f32 %v722_v31, %v722_v31  ;;  %v686_v1 = vpop.f32.mrb[7].mxu0  ;;  %v724_v32 = vpop.f32.mrb[5].mxu1 }
 0x503   :  { %v726_v2 = vpop.f32.mrb[6].mxu1  ;;  %v730_v0 = vadd.f32 %v729_v23, %v722_v31  ;;  %v738_v33 = vadd.f32 %v735_v29, %v734_v17  ;;  %v737_v35 = vmul.f32 %v724_v32, %v724_v32 }
 0x504   :  { %v727_v45 = vpop.f32.mrb[7].mxu1 }
 0x505   :  { %v731_v34 = vadd.f32 %v730_v0, %v724_v32  ;;  %v739_v36 = vadd.f32 %v738_v33, %v736_v9 }
 0x507   :  { %732 = vadd.xlane.f32.xlu0 %v731_v34  ;;  %v740_v37 = vadd.f32 %v739_v36, %v737_v35 }
 0x509   :  { %741 = vadd.xlane.f32.xlu1 %v740_v37 }
 0x594   :  { %v733_v39 = vpop.xlane.xlu0 %732 }
 0x595   :  { %v743_v40 = vmul.f32 0.001953125, %v733_v39 }
 0x596   :  { %v742_v4 = vpop.xlane.xlu1 %741 }
 0x597   :  { %v745_v41 = vmul.f32 %v743_v40, %v743_v40  ;;  %v744_v11 = vmul.f32 0.001953125, %v742_v4 }
 0x599   :  { %v746_v13 = vsub.f32 %v744_v11, %v745_v41 }
 0x59b   :  { %v747_v44 = vmax.f32 %v746_v13, 0.0 }
 0x59d   :  { %v748_v24 = vadd.f32 1e-05, %v747_v44 }
 0x59f   :  { %965 = vrsqrt.f32 %v748_v24 }
 0x5a9   :  { %v966_v46 = vpop.eup %965 }
 0x5aa   :  { %v750_v47 = vmul.f32 %v966_v46, %v482_v27 }
 0x5ac   :  { %755 = vperm.xlu0 %886, %v750_v47   ;;  %v751_v52 = vmul.f32 %v750_v47, %v743_v40 }
 0x5ae   :  { %v752_v60 = vsub.f32 %v483_v50, %v751_v52 }
 0x5b0   :  { %764 = vperm.xlu1 %887, %v752_v60  }
 0x62b   :  { %v756_v61 = vpop.permute.xlu0 %755 }
 0x62c   :  { %v758_v62 = vmul.f32 %v756_v61, %v681_v54  ;;  %v759_v48 = vmul.f32 %v756_v61, %v683_v19  ;;  %v760_v63 = vmul.f32 %v756_v61, %v722_v31  ;;  %v761_v49 = vmul.f32 %v756_v61, %v724_v32 }
 0x62f   :  { %v765_v3 = vpop.permute.xlu1 %764 }
 0x630   :  { %v767_v5 = vadd.f32 %v765_v3, %v758_v62  ;;  %v768_v57 = vadd.f32 %v765_v3, %v759_v48  ;;  %v769_v58 = vadd.f32 %v765_v3, %v760_v63  ;;  %v770_v59 = vadd.f32 %v765_v3, %v761_v49 }
 0x632   :  { %v771_v42 = vadd.f32 %v967_v43, %v767_v5  ;;  %v772_v7 = vadd.f32 %v968_v6, %v768_v57  ;;  %v773_v12 = vadd.f32 %v969_v10, %v769_v58  ;;  %v774_v25 = vadd.f32 %v970_v14, %v770_v59 }
 0x634   :  { %v775_v28 = vmax.f32 %v771_v42, 0.0  ;;  %v776_v16 = vmax.f32 %v772_v7, 0.0  ;;  %v777_v15 = vmax.f32 %v773_v12, 0.0  ;;  %v778_v18 = vmax.f32 %v774_v25, 0.0 }
 0x636   :  { %779 = vst [vmem:[#allocation2] sm:$0xff] %v775_v28  ;;  %780 = vst [vmem:[#allocation2 + $0x8] sm:$0xff] %v776_v16 }
 0x637   :  { %781 = vst [vmem:[#allocation2 + $0x10] sm:$0xff] %v777_v15  ;;  %782 = vst [vmem:[#allocation2 + $0x18] sm:$0xff] %v778_v18 }
 0x638   :  { %982 = shalt.err (!%p979_p4)
}
 0x639   :  { %s983_s0 = scalar_lea.hbm %s1620_s7, 512 }
 0x63a   :  { %p984_p5 = scmp.ne.s32.totalorder %s1620_s7, %s983_s0  ;;  %p987_p6 = scmp.lt.u32.totalorder %s983_s0, %s1620_s7 }
 0x63c   :  { %p989_p7 = pnand %p987_p6, %p984_p5 }
 0x63e   :  { %992 = shalt.err (!%p989_p7)
}
 0x63f   :  { %792 = dma.vmem_to_hbm [thread:$0]  %s790_s21, 512, %s1620_s7, [#allocation3]  }
 0x640   :  { %993 = dma.done.wait [#allocation3], 512  }
 0x641   :  { %994 = vsyncadd [#allocation3], 4294966784 }
 0x642   :  { %796 = vsyncpa [#allocation3], 1 }

</bundles_post_ra>
